<compile_context>
chip_gen: v5e
topology: v5e:2x2
jax: 0.10.0
libtpu: 0.0.40
codegen_flags: <defaults>
</compile_context>

<pallas_src>
import jax
import jax.numpy as jnp
from jax.experimental import pallas as pl
from jax.experimental.pallas import tpu as pltpu


BN_EPS = 1e-5
LANE = 128


def _round_up(n, m):
    return (n + m - 1) // m * m


def _pick_tk(hid_p, target):
    """Largest multiple-of-128 slab width <= target that divides hid_p."""
    tk = max(LANE, (min(hid_p, target) // LANE) * LANE)
    while hid_p % tk != 0:
        tk -= LANE
    return max(tk, LANE)


def _mlp_slab(x_f32, w1_ref, bn_ref, w2_ref, acc_ref):
    """One hidden-dim slab of: Linear(no bias) -> BN(batch stats) -> ReLU ->
    partial Linear2, accumulated into acc_ref (f32)."""
    # ---- Linear 1 (no bias), bf16 MXU / f32 accumulate ----
    h = jnp.dot(x_f32.astype(jnp.bfloat16), w1_ref[...],
                preferred_element_type=jnp.float32)            # (B, TK)

    # ---- BatchNorm1d (training mode) with folded scale ----
    bn = bn_ref[...]                                           # (2, TK): gamma, beta
    gamma, beta = bn[0:1, :], bn[1:2, :]
    mean = jnp.mean(h, axis=0, keepdims=True)
    centered = h - mean
    var = jnp.mean(centered * centered, axis=0, keepdims=True)
    scale = jax.lax.rsqrt(var + BN_EPS) * gamma                # (1, TK) fold first
    h = jnp.maximum(centered * scale + beta, 0.0)              # BN + ReLU

    # ---- Linear 2 partial product over this K slab ----
    acc_ref[...] += jnp.dot(h.astype(jnp.bfloat16), w2_ref[...],
                            preferred_element_type=jnp.float32)


def siamese_kernel(x_ref,
                   pw1_ref, pbn_ref, pw2_ref, pb2_ref,   # projector
                   qw1_ref, qbn_ref, qw2_ref, qb2_ref,   # predictor
                   z_ref, h_ref, acc_ref):
    phase = pl.program_id(0)            # 0 = projector, 1 = predictor
    k = pl.program_id(1)                # hidden-dim slab (reduction axis)
    last = pl.num_programs(1) - 1

    @pl.when(k == 0)
    def _():                            # new phase -> reset accumulator
        acc_ref[...] = jnp.zeros_like(acc_ref)

    @pl.when(phase == 0)
    def _():
        _mlp_slab(x_ref[...], pw1_ref, pbn_ref, pw2_ref, acc_ref)

    @pl.when(phase == 1)
    def _():
        # z_ref has a constant block index -> resident in VMEM; the predictor
        # consumes z without an HBM round trip.
        _mlp_slab(z_ref[...], qw1_ref, qbn_ref, qw2_ref, acc_ref)

    @pl.when((phase == 0) & (k == last))
    def _():
        z_ref[...] = (acc_ref[...] + pb2_ref[...]).astype(z_ref.dtype)

    @pl.when((phase == 1) & (k == last))
    def _():
        h_ref[...] = (acc_ref[...] + qb2_ref[...]).astype(h_ref.dtype)


def siamese_arm_forward(x, projector_packed, predictor_packed, out_dim, *,
                        tk_hidden=512):
    """x: (B, D_in) f32. Packed params are lane-padded (see pack_mlp_params)."""
    # TODO(synk): encoder is None in the reference __init__ (forward would crash
    # in PyTorch); treated as identity here.
    y = x
    B, d_in = x.shape
    pw1, pbn, pw2, pb2 = projector_packed
    qw1, qbn, qw2, qb2 = predictor_packed
    din_p, hid_p = pw1.shape
    out_p = pw2.shape[1]
    assert qw1.shape == (out_p, hid_p) and qw2.shape == (hid_p, out_p)

    # One-time pad of the input feature dim to a lane multiple (matmul K axis).
    if d_in != din_p:
        x = jnp.zeros((B, din_p), x.dtype).at[:, :d_in].set(x)

    tk = _pick_tk(hid_p, tk_hidden)
    nk = hid_p // tk
    last = nk - 1

    # Stream the active MLP's slabs along k; freeze the idle MLP's slab index so
    # no redundant DMA is issued during the other phase.
    def _proj_slab(p, k):
        return k * (1 - p) + last * p

    def _pred_slab(p, k):
        return k * p

    in_specs = [
        pl.BlockSpec((B, din_p),   lambda p, k: (0, 0)),                  # x (resident)
        pl.BlockSpec((din_p, tk),  lambda p, k: (0, _proj_slab(p, k))),   # pw1 slab
        pl.BlockSpec((2, tk),      lambda p, k: (0, _proj_slab(p, k))),   # pbn slab
        pl.BlockSpec((tk, out_p),  lambda p, k: (_proj_slab(p, k), 0)),   # pw2 slab
        pl.BlockSpec((1, out_p),   lambda p, k: (0, 0)),                  # pb2
        pl.BlockSpec((out_p, tk),  lambda p, k: (0, _pred_slab(p, k))),   # qw1 slab
        pl.BlockSpec((2, tk),      lambda p, k: (0, _pred_slab(p, k))),   # qbn slab
        pl.BlockSpec((tk, out_p),  lambda p, k: (_pred_slab(p, k), 0)),   # qw2 slab
        pl.BlockSpec((1, out_p),   lambda p, k: (0, 0)),                  # qb2
    ]
    out_specs = (pl.BlockSpec((B, out_p), lambda p, k: (0, 0)),           # z (resident)
                 pl.BlockSpec((B, out_p), lambda p, k: (0, 0)))           # h (resident)

    # Double-buffer-aware VMEM estimate (review: explicit vmem_limit_bytes).
    f32b, bf16b = 4, 2
    est = 2 * (B * din_p * f32b
               + (din_p + out_p) * tk * bf16b       # w1 slabs (proj + pred)
               + 2 * tk * out_p * bf16b             # w2 slabs
               + 2 * 2 * tk * f32b                  # gamma/beta slabs
               + 2 * out_p * f32b                   # biases
               + 2 * B * out_p * f32b)              # z, h
    est += B * out_p * f32b + (4 << 20)             # accumulator + headroom
    vmem_limit = int(min(100 << 20, max(est, 16 << 20)))

    flops = 2 * B * (din_p * hid_p + hid_p * out_p) \
          + 2 * B * (out_p * hid_p + hid_p * out_p)
    bytes_accessed = int(B * din_p * 4
                         + sum(int(a.size) * a.dtype.itemsize
                               for a in (pw1, pbn, pw2, pb2, qw1, qbn, qw2, qb2))
                         + 2 * B * out_p * 4)
    cost = pl.CostEstimate(flops=flops, transcendentals=2 * hid_p,
                           bytes_accessed=bytes_accessed)

    z_pad, h_pad = pl.pallas_call(
        siamese_kernel,
        out_shape=(jax.ShapeDtypeStruct((B, out_p), jnp.float32),
                   jax.ShapeDtypeStruct((B, out_p), jnp.float32)),
        grid_spec=pltpu.PrefetchScalarGridSpec(
            num_scalar_prefetch=0,
            grid=(2, nk),                       # (phase, hidden slab)
            in_specs=in_specs,
            out_specs=out_specs,
            scratch_shapes=[pltpu.VMEM((B, out_p), jnp.float32)]),
        compiler_params=pltpu.CompilerParams(
            # phase has a true data dependency (predictor reads z), k is a
            # reduction -> both "arbitrary".
            dimension_semantics=("arbitrary", "arbitrary"),
            vmem_limit_bytes=vmem_limit),
        cost_estimate=cost,
    )(x, pw1, pbn, pw2, pb2, qw1, qbn, qw2, qb2)

    return y, z_pad[:, :out_dim], h_pad[:, :out_dim]


def make_mlp_params(key, input_dim, hidden_size, output_dim):
    """Natural-shape f32 params matching nn.Linear / nn.BatchNorm1d init."""
    k1, k2, k3 = jax.random.split(key, 3)
    bound1 = 1.0 / jnp.sqrt(input_dim)
    w1 = jax.random.uniform(k1, (input_dim, hidden_size), jnp.float32, -bound1, bound1)
    gamma = jnp.ones((hidden_size,), jnp.float32)
    beta = jnp.zeros((hidden_size,), jnp.float32)
    bound2 = 1.0 / jnp.sqrt(hidden_size)
    w2 = jax.random.uniform(k2, (hidden_size, output_dim), jnp.float32, -bound2, bound2)
    b2 = jax.random.uniform(k3, (output_dim,), jnp.float32, -bound2, bound2)
    return (w1, gamma, beta, w2, b2)


def pack_mlp_params(params, in_pad=None):
    """Zero-pad feature dims to lane multiples (128), cast matmul weights to
    bf16, pack gamma/beta into one (2, H_pad) array. Padded hidden features
    produce 0 after BN (gamma=beta=0) and padded w2 rows/cols are 0, so the
    sliced outputs are unchanged (keep this zero-pad invariant)."""
    w1, gamma, beta, w2, b2 = params
    d_in, hid = w1.shape
    out = w2.shape[1]
    in_p = _round_up(d_in, LANE) if in_pad is None else in_pad
    hid_p = _round_up(hid, LANE)
    out_p = _round_up(out, LANE)

    w1_p = jnp.zeros((in_p, hid_p), jnp.bfloat16).at[:d_in, :hid].set(
        w1.astype(jnp.bfloat16))
    bn_p = jnp.zeros((2, hid_p), jnp.float32)
    bn_p = bn_p.at[0, :hid].set(gamma).at[1, :hid].set(beta)
    w2_p = jnp.zeros((hid_p, out_p), jnp.bfloat16).at[:hid, :out].set(
        w2.astype(jnp.bfloat16))
    b2_p = jnp.zeros((1, out_p), jnp.float32).at[0, :out].set(b2)
    return (w1_p, bn_p, w2_p, b2_p)


def _mlp_ref(x, params):
    """Pure-JAX reference mirroring the kernel's bf16-at-MXU / f32-BN numerics."""
    w1, gamma, beta, w2, b2 = params
    h = jnp.dot(x.astype(jnp.bfloat16), w1.astype(jnp.bfloat16),
                preferred_element_type=jnp.float32)
    mean = h.mean(axis=0, keepdims=True)
    var = ((h - mean) ** 2).mean(axis=0, keepdims=True)
    h = (h - mean) * jax.lax.rsqrt(var + BN_EPS) * gamma[None, :] + beta[None, :]
    h = jnp.maximum(h, 0.0)
    return jnp.dot(h.astype(jnp.bfloat16), w2.astype(jnp.bfloat16),
                   preferred_element_type=jnp.float32) + b2[None, :]


if __name__ == "__main__":
    # Small, shape-consistent scaled-down config:
    #   projector: MLP(input_dim=32, hidden=256, output_dim=16)
    #   predictor: MLP(input_dim=16, hidden=256, output_dim=16)
    # tk_hidden=128 -> 2 hidden slabs per MLP, exercising the K-tiled grid.
    B, IN_DIM, HIDDEN, OUT_DIM = 8, 32, 256, 16

    key = jax.random.PRNGKey(0)
    kx, kproj, kpred = jax.random.split(key, 3)

    x = jax.random.normal(kx, (B, IN_DIM), jnp.float32)
    projector_params = make_mlp_params(kproj, IN_DIM, HIDDEN, OUT_DIM)
    predictor_params = make_mlp_params(kpred, OUT_DIM, HIDDEN, OUT_DIM)

    proj_packed = pack_mlp_params(projector_params)
    out_p = proj_packed[2].shape[1]                      # predictor sees padded z
    pred_packed = pack_mlp_params(predictor_params, in_pad=out_p)

    y, z, h = siamese_arm_forward(x, proj_packed, pred_packed, OUT_DIM,
                                  tk_hidden=128)
    jax.block_until_ready((y, z, h))

    # Correctness check against pure-JAX reference (same bf16-matmul numerics).
    z_ref = _mlp_ref(x, projector_params)
    h_ref = _mlp_ref(z_ref, predictor_params)
    assert jnp.allclose(z, z_ref, atol=5e-3, rtol=5e-3), "projector mismatch"
    assert jnp.allclose(h, h_ref, atol=5e-3, rtol=5e-3), "predictor mismatch"
    assert y.shape == (B, IN_DIM) and z.shape == (B, OUT_DIM) and h.shape == (B, OUT_DIM)

    print("KERNEL_OK")
</pallas_src>

<mosaic_0001>
module attributes {stable_mosaic.version = 11 : i64} {
  func.func @siamese_kernel(%arg0: i32, %arg1: i32, %arg2: memref<8x128xf32, #tpu.memory_space<vmem>>, %arg3: memref<128x128xbf16, #tpu.memory_space<vmem>>, %arg4: memref<2x128xf32, #tpu.memory_space<vmem>>, %arg5: memref<128x128xbf16, #tpu.memory_space<vmem>>, %arg6: memref<1x128xf32, #tpu.memory_space<vmem>>, %arg7: memref<128x128xbf16, #tpu.memory_space<vmem>>, %arg8: memref<2x128xf32, #tpu.memory_space<vmem>>, %arg9: memref<128x128xbf16, #tpu.memory_space<vmem>>, %arg10: memref<1x128xf32, #tpu.memory_space<vmem>>, %arg11: memref<8x128xf32, #tpu.memory_space<vmem>>, %arg12: memref<8x128xf32, #tpu.memory_space<vmem>>, %arg13: memref<8x128xf32, #tpu.memory_space<vmem>>) attributes {dimension_semantics = [#tpu.dimension_semantics<arbitrary>, #tpu.dimension_semantics<arbitrary>], iteration_bounds = array<i64: 2, 2>, scalar_prefetch = 0 : i64, scratch_operands = 1 : i64, tpu.core_type = #tpu.core_type<tc>, window_params = [{pipeline_mode = #tpu.pipeline_mode<synchronous>, transform_indices = @transform_0, window_bounds = array<i64: 8, 128>}, {transform_indices = @transform_1, window_bounds = array<i64: 128, 128>}, {transform_indices = @transform_2, window_bounds = array<i64: 2, 128>}, {transform_indices = @transform_3, window_bounds = array<i64: 128, 128>}, {pipeline_mode = #tpu.pipeline_mode<synchronous>, transform_indices = @transform_4, window_bounds = array<i64: 1, 128>}, {transform_indices = @transform_5, window_bounds = array<i64: 128, 128>}, {transform_indices = @transform_6, window_bounds = array<i64: 2, 128>}, {transform_indices = @transform_7, window_bounds = array<i64: 128, 128>}, {pipeline_mode = #tpu.pipeline_mode<synchronous>, transform_indices = @transform_8, window_bounds = array<i64: 1, 128>}, {pipeline_mode = #tpu.pipeline_mode<synchronous>, transform_indices = @transform_9, window_bounds = array<i64: 8, 128>}, {pipeline_mode = #tpu.pipeline_mode<synchronous>, transform_indices = @transform_10, window_bounds = array<i64: 8, 128>}]} {
    %c0_i32 = arith.constant 0 : i32
    %0 = arith.cmpi eq, %arg1, %c0_i32 : i32
    %1 = arith.extui %0 : i1 to i32
    %c0_i32_0 = arith.constant 0 : i32
    %2 = arith.cmpi ne, %1, %c0_i32_0 : i32
    scf.if %2 {
      %cst = arith.constant 0.000000e+00 : f32
      %19 = vector.broadcast %cst : f32 to vector<8x128xf32>
      %c0 = arith.constant 0 : index
      %c0_10 = arith.constant 0 : index
      %20 = vector.load %arg13[%c0, %c0_10] : memref<8x128xf32, #tpu.memory_space<vmem>>, vector<8x128xf32>
      tpu.vector_store %arg13[%c0, %c0_10], %19 {strides = array<i32>} : memref<8x128xf32, #tpu.memory_space<vmem>>, vector<8x128xf32>,
    } else {
    }
    %c0_i32_1 = arith.constant 0 : i32
    %3 = arith.cmpi eq, %arg0, %c0_i32_1 : i32
    %4 = arith.extui %3 : i1 to i32
    %c0_i32_2 = arith.constant 0 : i32
    %5 = arith.cmpi ne, %4, %c0_i32_2 : i32
    scf.if %5 {
      %c0 = arith.constant 0 : index
      %c0_10 = arith.constant 0 : index
      %19 = vector.load %arg2[%c0, %c0_10] : memref<8x128xf32, #tpu.memory_space<vmem>>, vector<8x128xf32>
      %20 = arith.truncf %19 : vector<8x128xf32> to vector<8x128xbf16>
      %c0_11 = arith.constant 0 : index
      %c0_12 = arith.constant 0 : index
      %21 = vector.load %arg3[%c0_11, %c0_12] : memref<128x128xbf16, #tpu.memory_space<vmem>>, vector<128x128xbf16>
      %cst = arith.constant dense<0.000000e+00> : vector<8x128xf32>
      %22 = tpu.matmul %20, %21, %cst {dimension_numbers = #tpu.dot_dimension_numbers<[1], [0], [0], [1], [0, 0, 1, 1], [], []>} : vector<8x128xbf16>, vector<128x128xbf16>, vector<8x128xf32> -> vector<8x128xf32>
      %c0_13 = arith.constant 0 : index
      %c0_14 = arith.constant 0 : index
      %23 = vector.load %arg4[%c0_13, %c0_14] : memref<2x128xf32, #tpu.memory_space<vmem>>, vector<2x128xf32>
      %24 = vector.extract_strided_slice %23 {offsets = [0, 0], sizes = [1, 128], strides = [1, 1]} : vector<2x128xf32> to vector<1x128xf32>
      %25 = vector.extract_strided_slice %23 {offsets = [1, 0], sizes = [1, 128], strides = [1, 1]} : vector<2x128xf32> to vector<1x128xf32>
      %cst_15 = arith.constant dense<0.000000e+00> : vector<128xf32>
      %26 = vector.multi_reduction <add>, %22, %cst_15 [0] : vector<8x128xf32> to vector<128xf32>
      %27 = vector.shape_cast %26 : vector<128xf32> to vector<1x128xf32>
      %cst_16 = arith.constant 8.000000e+00 : f32
      %28 = vector.broadcast %cst_16 : f32 to vector<1x128xf32>
      %29 = arith.divf %27, %28 : vector<1x128xf32>
      %30 = vector.broadcast %29 : vector<1x128xf32> to vector<8x128xf32>
      %31 = arith.subf %22, %30 : vector<8x128xf32>
      %32 = arith.mulf %31, %31 : vector<8x128xf32>
      %cst_17 = arith.constant dense<0.000000e+00> : vector<128xf32>
      %33 = vector.multi_reduction <add>, %32, %cst_17 [0] : vector<8x128xf32> to vector<128xf32>
      %34 = vector.shape_cast %33 : vector<128xf32> to vector<1x128xf32>
      %cst_18 = arith.constant 8.000000e+00 : f32
      %35 = vector.broadcast %cst_18 : f32 to vector<1x128xf32>
      %36 = arith.divf %34, %35 : vector<1x128xf32>
      %cst_19 = arith.constant 9.99999974E-6 : f32
      %37 = vector.broadcast %cst_19 : f32 to vector<1x128xf32>
      %38 = arith.addf %36, %37 : vector<1x128xf32>
      %39 = math.rsqrt %38 : vector<1x128xf32>
      %40 = arith.mulf %39, %24 : vector<1x128xf32>
      %41 = vector.broadcast %40 : vector<1x128xf32> to vector<8x128xf32>
      %42 = arith.mulf %31, %41 : vector<8x128xf32>
      %43 = vector.broadcast %25 : vector<1x128xf32> to vector<8x128xf32>
      %44 = arith.addf %42, %43 : vector<8x128xf32>
      %cst_20 = arith.constant 0.000000e+00 : f32
      %45 = vector.broadcast %cst_20 : f32 to vector<8x128xf32>
      %46 = arith.maximumf %44, %45 : vector<8x128xf32>
      %c0_21 = arith.constant 0 : index
      %c0_22 = arith.constant 0 : index
      %47 = vector.load %arg13[%c0_21, %c0_22] : memref<8x128xf32, #tpu.memory_space<vmem>>, vector<8x128xf32>
      %48 = arith.truncf %46 : vector<8x128xf32> to vector<8x128xbf16>
      %c0_23 = arith.constant 0 : index
      %c0_24 = arith.constant 0 : index
      %49 = vector.load %arg5[%c0_23, %c0_24] : memref<128x128xbf16, #tpu.memory_space<vmem>>, vector<128x128xbf16>
      %cst_25 = arith.constant dense<0.000000e+00> : vector<8x128xf32>
      %50 = tpu.matmul %48, %49, %cst_25 {dimension_numbers = #tpu.dot_dimension_numbers<[1], [0], [0], [1], [0, 0, 1, 1], [], []>} : vector<8x128xbf16>, vector<128x128xbf16>, vector<8x128xf32> -> vector<8x128xf32>
      %51 = arith.addf %47, %50 : vector<8x128xf32>
      %c0_26 = arith.constant 0 : index
      %c0_27 = arith.constant 0 : index
      %52 = vector.load %arg13[%c0_26, %c0_27] : memref<8x128xf32, #tpu.memory_space<vmem>>, vector<8x128xf32>
      tpu.vector_store %arg13[%c0_26, %c0_27], %51 {strides = array<i32>} : memref<8x128xf32, #tpu.memory_space<vmem>>, vector<8x128xf32>,
    } else {
    }
    %c1_i32 = arith.constant 1 : i32
    %6 = arith.cmpi eq, %arg0, %c1_i32 : i32
    %7 = arith.extui %6 : i1 to i32
    %c0_i32_3 = arith.constant 0 : i32
    %8 = arith.cmpi ne, %7, %c0_i32_3 : i32
    scf.if %8 {
      %c0 = arith.constant 0 : index
      %c0_10 = arith.constant 0 : index
      %19 = vector.load %arg11[%c0, %c0_10] : memref<8x128xf32, #tpu.memory_space<vmem>>, vector<8x128xf32>
      %20 = arith.truncf %19 : vector<8x128xf32> to vector<8x128xbf16>
      %c0_11 = arith.constant 0 : index
      %c0_12 = arith.constant 0 : index
      %21 = vector.load %arg7[%c0_11, %c0_12] : memref<128x128xbf16, #tpu.memory_space<vmem>>, vector<128x128xbf16>
      %cst = arith.constant dense<0.000000e+00> : vector<8x128xf32>
      %22 = tpu.matmul %20, %21, %cst {dimension_numbers = #tpu.dot_dimension_numbers<[1], [0], [0], [1], [0, 0, 1, 1], [], []>} : vector<8x128xbf16>, vector<128x128xbf16>, vector<8x128xf32> -> vector<8x128xf32>
      %c0_13 = arith.constant 0 : index
      %c0_14 = arith.constant 0 : index
      %23 = vector.load %arg8[%c0_13, %c0_14] : memref<2x128xf32, #tpu.memory_space<vmem>>, vector<2x128xf32>
      %24 = vector.extract_strided_slice %23 {offsets = [0, 0], sizes = [1, 128], strides = [1, 1]} : vector<2x128xf32> to vector<1x128xf32>
      %25 = vector.extract_strided_slice %23 {offsets = [1, 0], sizes = [1, 128], strides = [1, 1]} : vector<2x128xf32> to vector<1x128xf32>
      %cst_15 = arith.constant dense<0.000000e+00> : vector<128xf32>
      %26 = vector.multi_reduction <add>, %22, %cst_15 [0] : vector<8x128xf32> to vector<128xf32>
      %27 = vector.shape_cast %26 : vector<128xf32> to vector<1x128xf32>
      %cst_16 = arith.constant 8.000000e+00 : f32
      %28 = vector.broadcast %cst_16 : f32 to vector<1x128xf32>
      %29 = arith.divf %27, %28 : vector<1x128xf32>
      %30 = vector.broadcast %29 : vector<1x128xf32> to vector<8x128xf32>
      %31 = arith.subf %22, %30 : vector<8x128xf32>
      %32 = arith.mulf %31, %31 : vector<8x128xf32>
      %cst_17 = arith.constant dense<0.000000e+00> : vector<128xf32>
      %33 = vector.multi_reduction <add>, %32, %cst_17 [0] : vector<8x128xf32> to vector<128xf32>
      %34 = vector.shape_cast %33 : vector<128xf32> to vector<1x128xf32>
      %cst_18 = arith.constant 8.000000e+00 : f32
      %35 = vector.broadcast %cst_18 : f32 to vector<1x128xf32>
      %36 = arith.divf %34, %35 : vector<1x128xf32>
      %cst_19 = arith.constant 9.99999974E-6 : f32
      %37 = vector.broadcast %cst_19 : f32 to vector<1x128xf32>
      %38 = arith.addf %36, %37 : vector<1x128xf32>
      %39 = math.rsqrt %38 : vector<1x128xf32>
      %40 = arith.mulf %39, %24 : vector<1x128xf32>
      %41 = vector.broadcast %40 : vector<1x128xf32> to vector<8x128xf32>
      %42 = arith.mulf %31, %41 : vector<8x128xf32>
      %43 = vector.broadcast %25 : vector<1x128xf32> to vector<8x128xf32>
      %44 = arith.addf %42, %43 : vector<8x128xf32>
      %cst_20 = arith.constant 0.000000e+00 : f32
      %45 = vector.broadcast %cst_20 : f32 to vector<8x128xf32>
      %46 = arith.maximumf %44, %45 : vector<8x128xf32>
      %c0_21 = arith.constant 0 : index
      %c0_22 = arith.constant 0 : index
      %47 = vector.load %arg13[%c0_21, %c0_22] : memref<8x128xf32, #tpu.memory_space<vmem>>, vector<8x128xf32>
      %48 = arith.truncf %46 : vector<8x128xf32> to vector<8x128xbf16>
      %c0_23 = arith.constant 0 : index
      %c0_24 = arith.constant 0 : index
      %49 = vector.load %arg9[%c0_23, %c0_24] : memref<128x128xbf16, #tpu.memory_space<vmem>>, vector<128x128xbf16>
      %cst_25 = arith.constant dense<0.000000e+00> : vector<8x128xf32>
      %50 = tpu.matmul %48, %49, %cst_25 {dimension_numbers = #tpu.dot_dimension_numbers<[1], [0], [0], [1], [0, 0, 1, 1], [], []>} : vector<8x128xbf16>, vector<128x128xbf16>, vector<8x128xf32> -> vector<8x128xf32>
      %51 = arith.addf %47, %50 : vector<8x128xf32>
      %c0_26 = arith.constant 0 : index
      %c0_27 = arith.constant 0 : index
      %52 = vector.load %arg13[%c0_26, %c0_27] : memref<8x128xf32, #tpu.memory_space<vmem>>, vector<8x128xf32>
      tpu.vector_store %arg13[%c0_26, %c0_27], %51 {strides = array<i32>} : memref<8x128xf32, #tpu.memory_space<vmem>>, vector<8x128xf32>,
    } else {
    }
    %c0_i32_4 = arith.constant 0 : i32
    %9 = arith.cmpi eq, %arg0, %c0_i32_4 : i32
    %c1_i32_5 = arith.constant 1 : i32
    %10 = arith.cmpi eq, %arg1, %c1_i32_5 : i32
    %11 = arith.andi %9, %10 : i1
    %12 = arith.extui %11 : i1 to i32
    %c0_i32_6 = arith.constant 0 : i32
    %13 = arith.cmpi ne, %12, %c0_i32_6 : i32
    scf.if %13 {
      %c0 = arith.constant 0 : index
      %c0_10 = arith.constant 0 : index
      %19 = vector.load %arg13[%c0, %c0_10] : memref<8x128xf32, #tpu.memory_space<vmem>>, vector<8x128xf32>
      %c0_11 = arith.constant 0 : index
      %c0_12 = arith.constant 0 : index
      %20 = vector.load %arg6[%c0_11, %c0_12] : memref<1x128xf32, #tpu.memory_space<vmem>>, vector<1x128xf32>
      %21 = vector.broadcast %20 : vector<1x128xf32> to vector<8x128xf32>
      %22 = arith.addf %19, %21 : vector<8x128xf32>
      %c0_13 = arith.constant 0 : index
      %c0_14 = arith.constant 0 : index
      %23 = vector.load %arg11[%c0_13, %c0_14] : memref<8x128xf32, #tpu.memory_space<vmem>>, vector<8x128xf32>
      tpu.vector_store %arg11[%c0_13, %c0_14], %22 {strides = array<i32>} : memref<8x128xf32, #tpu.memory_space<vmem>>, vector<8x128xf32>,
    } else {
    }
    %c1_i32_7 = arith.constant 1 : i32
    %14 = arith.cmpi eq, %arg0, %c1_i32_7 : i32
    %c1_i32_8 = arith.constant 1 : i32
    %15 = arith.cmpi eq, %arg1, %c1_i32_8 : i32
    %16 = arith.andi %14, %15 : i1
    %17 = arith.extui %16 : i1 to i32
    %c0_i32_9 = arith.constant 0 : i32
    %18 = arith.cmpi ne, %17, %c0_i32_9 : i32
    scf.if %18 {
      %c0 = arith.constant 0 : index
      %c0_10 = arith.constant 0 : index
      %19 = vector.load %arg13[%c0, %c0_10] : memref<8x128xf32, #tpu.memory_space<vmem>>, vector<8x128xf32>
      %c0_11 = arith.constant 0 : index
      %c0_12 = arith.constant 0 : index
      %20 = vector.load %arg10[%c0_11, %c0_12] : memref<1x128xf32, #tpu.memory_space<vmem>>, vector<1x128xf32>
      %21 = vector.broadcast %20 : vector<1x128xf32> to vector<8x128xf32>
      %22 = arith.addf %19, %21 : vector<8x128xf32>
      %c0_13 = arith.constant 0 : index
      %c0_14 = arith.constant 0 : index
      %23 = vector.load %arg12[%c0_13, %c0_14] : memref<8x128xf32, #tpu.memory_space<vmem>>, vector<8x128xf32>
      tpu.vector_store %arg12[%c0_13, %c0_14], %22 {strides = array<i32>} : memref<8x128xf32, #tpu.memory_space<vmem>>, vector<8x128xf32>,
    } else {
    }
    return
  }
  func.func @transform_0(%arg0: i32, %arg1: i32) -> (i32, i32) {
    %c0_i32 = arith.constant 0 : i32
    %c0_i32_0 = arith.constant 0 : i32
    %c0_i32_1 = arith.constant 0 : i32
    return %c0_i32, %c0_i32_0 : i32, i32
  }
  func.func @transform_1(%arg0: i32, %arg1: i32) -> (i32, i32) {
    %c1_i32 = arith.constant 1 : i32
    %0 = arith.subi %c1_i32, %arg0 : i32
    %1 = arith.muli %arg1, %0 : i32
    %c1_i32_0 = arith.constant 1 : i32
    %2 = arith.muli %c1_i32_0, %arg0 : i32
    %3 = arith.addi %1, %2 : i32
    %c0_i32 = arith.constant 0 : i32
    %c0_i32_1 = arith.constant 0 : i32
    return %c0_i32, %3 : i32, i32
  }
  func.func @transform_2(%arg0: i32, %arg1: i32) -> (i32, i32) {
    %c1_i32 = arith.constant 1 : i32
    %0 = arith.subi %c1_i32, %arg0 : i32
    %1 = arith.muli %arg1, %0 : i32
    %c1_i32_0 = arith.constant 1 : i32
    %2 = arith.muli %c1_i32_0, %arg0 : i32
    %3 = arith.addi %1, %2 : i32
    %c0_i32 = arith.constant 0 : i32
    %c0_i32_1 = arith.constant 0 : i32
    return %c0_i32, %3 : i32, i32
  }
  func.func @transform_3(%arg0: i32, %arg1: i32) -> (i32, i32) {
    %c1_i32 = arith.constant 1 : i32
    %0 = arith.subi %c1_i32, %arg0 : i32
    %1 = arith.muli %arg1, %0 : i32
    %c1_i32_0 = arith.constant 1 : i32
    %2 = arith.muli %c1_i32_0, %arg0 : i32
    %3 = arith.addi %1, %2 : i32
    %c0_i32 = arith.constant 0 : i32
    %c0_i32_1 = arith.constant 0 : i32
    return %3, %c0_i32 : i32, i32
  }
  func.func @transform_4(%arg0: i32, %arg1: i32) -> (i32, i32) {
    %c0_i32 = arith.constant 0 : i32
    %c0_i32_0 = arith.constant 0 : i32
    %c0_i32_1 = arith.constant 0 : i32
    return %c0_i32, %c0_i32_0 : i32, i32
  }
  func.func @transform_5(%arg0: i32, %arg1: i32) -> (i32, i32) {
    %0 = arith.muli %arg1, %arg0 : i32
    %c0_i32 = arith.constant 0 : i32
    %c0_i32_0 = arith.constant 0 : i32
    return %c0_i32, %0 : i32, i32
  }
  func.func @transform_6(%arg0: i32, %arg1: i32) -> (i32, i32) {
    %0 = arith.muli %arg1, %arg0 : i32
    %c0_i32 = arith.constant 0 : i32
    %c0_i32_0 = arith.constant 0 : i32
    return %c0_i32, %0 : i32, i32
  }
  func.func @transform_7(%arg0: i32, %arg1: i32) -> (i32, i32) {
    %0 = arith.muli %arg1, %arg0 : i32
    %c0_i32 = arith.constant 0 : i32
    %c0_i32_0 = arith.constant 0 : i32
    return %0, %c0_i32 : i32, i32
  }
  func.func @transform_8(%arg0: i32, %arg1: i32) -> (i32, i32) {
    %c0_i32 = arith.constant 0 : i32
    %c0_i32_0 = arith.constant 0 : i32
    %c0_i32_1 = arith.constant 0 : i32
    return %c0_i32, %c0_i32_0 : i32, i32
  }
  func.func @transform_9(%arg0: i32, %arg1: i32) -> (i32, i32) {
    %c0_i32 = arith.constant 0 : i32
    %c0_i32_0 = arith.constant 0 : i32
    %c0_i32_1 = arith.constant 0 : i32
    return %c0_i32, %c0_i32_0 : i32, i32
  }
  func.func @transform_10(%arg0: i32, %arg1: i32) -> (i32, i32) {
    %c0_i32 = arith.constant 0 : i32
    %c0_i32_0 = arith.constant 0 : i32
    %c0_i32_1 = arith.constant 0 : i32
    return %c0_i32, %c0_i32_0 : i32, i32
  }
}

</mosaic_0001>

<bundles_post_ra>
// kernel: tpu_custom_call.1
= control target key start
LH: loop header
LB: loop body
LE: loop exit
PB: predicated region body
PF: predicated region fallthrough
CT: control target
= control target key end

     0   :  { %s2402_s0 = inlined_call_operand.hbm [shape: f32[8,128], index: 0, kind: input, shape index: {}]   ;;  %s2403_s1 = inlined_call_operand.hbm [shape: bf16[128,256], index: 1, kind: input, shape index: {}]   ;;  %s2404_s2 = inlined_call_operand.hbm [shape: f32[2,256], index: 2, kind: input, shape index: {}]   ;;  %s2405_s3 = inlined_call_operand.hbm [shape: bf16[256,128], index: 3, kind: input, shape index: {}]   ;;  %s2406_s4 = inlined_call_operand.vmem [shape: f32[1,128], index: 4, kind: input, shape index: {}]   ;;  %s2407_s5 = inlined_call_operand.hbm [shape: bf16[128,256], index: 5, kind: input, shape index: {}]   ;;  %s2408_s6 = inlined_call_operand.vmem [shape: f32[2,256], index: 6, kind: input, shape index: {}]   ;;  %s2409_s7 = inlined_call_operand.hbm [shape: bf16[256,128], index: 7, kind: input, shape index: {}]   ;;  %s2410_s8 = inlined_call_operand.vmem [shape: f32[1,128], index: 8, kind: input, shape index: {}]   ;;  %s2411_s9 = inlined_call_operand.hbm [shape: f32[8,128], index: 9, kind: output, shape index: {0}]   ;;  %s2412_s10 = inlined_call_operand.hbm [shape: f32[8,128], index: 10, kind: output, shape index: {1}]  }
   0x1   :  { %2427 = sst [smem:[#allocation32_spill]] %s2402_s0 }
   0x2   :  { %2428 = sst [smem:[#allocation33_spill]] %s2403_s1 }
   0x3   :  { %2429 = sst [smem:[#allocation34_spill]] %s2404_s2 }
   0x4   :  { %2430 = sst [smem:[#allocation35_spill]] %s2405_s3 }
   0x5   :  { %2431 = sst [smem:[#allocation36_spill]] %s2406_s4 }
   0x6   :  { %2432 = sst [smem:[#allocation37_spill]] %s2407_s5 }
   0x7   :  { %2433 = sst [smem:[#allocation38_spill]] %s2408_s6 }
   0x8   :  { %2434 = sst [smem:[#allocation39_spill]] %s2409_s7 }
   0x9   :  { %2435 = sst [smem:[#allocation40_spill]] %s2410_s8 }
   0xa   :  { %2436 = sst [smem:[#allocation41_spill]] %s2411_s9 }
   0xb   :  { %2437 = sst [smem:[#allocation42_spill]] %s2412_s10 }
   0xc   :  { %16 = vsyncpa [#allocation4], 0 }
   0xd   :  { %17 = vsyncpa [#allocation7], 0 }
   0xe   :  { %19 = vsyncpa [#allocation7 + $0x1], 0 }
   0xf   :  { %20 = vsyncpa [#allocation10], 0 }
  0x10   :  { %22 = vsyncpa [#allocation10 + $0x1], 0 }
  0x11   :  { %23 = vsyncpa [#allocation13], 0 }
  0x12   :  { %25 = vsyncpa [#allocation13 + $0x1], 0 }
  0x13   :  { %26 = vsyncpa [#allocation5], 0 }
  0x14   :  { %27 = vsyncpa [#allocation16], 0  ;;  %s2034_s13 = smov 0   ;;  %s2036_s14 = smov 0  }
  0x15   :  { %s2038_s15 = smov 0   ;;  %s2040_s16 = smov 0  }
  0x16   :  { %s2042_s17 = smov 0   ;;  %s2044_s18 = smov 0  }
  0x17   :  { %s2046_s19 = smov 0   ;;  %s2048_s20 = smov 0  }
  0x18   :  { %s2050_s21 = smov 0   ;;  %s2052_s22 = smov 0  }
  0x19   :  { %s2054_s23 = smov 0  }
  0x1a LB: > { %2438 = sst [smem:[#allocation24_spill]] %s1948_s18  ;;  %s42_s24 = sadd.s32 1, %s1960_s21  ;;  %s1968_s23 = sphi %s2054_s23, %s33_s23   ;;  %s1964_s22 = sphi %s2052_s22, %s2494_s22   ;;  %s1960_s21 = sphi %s2050_s21, %s2486_s21   ;;  %s1956_s20 = sphi %s2048_s20, %s2493_s20   ;;  %s1952_s19 = sphi %s2046_s19, %s2484_s19   ;;  %s1948_s18 = sphi %s2044_s18, %s2492_s18   ;;  %s1944_s17 = sphi %s2042_s17, %s2491_s17   ;;  %s1940_s16 = sphi %s2040_s16, %s2490_s16   ;;  %s1936_s15 = sphi %s2038_s15, %s2489_s15   ;;  %s1932_s14 = sphi %s2036_s14, %s2488_s14   ;;  %s1928_s13 = sphi %s2034_s13, %s2487_s13  }
  0x1b   : > { %2439 = sst [smem:[#allocation25_spill]] %s1952_s19  ;;  %s45_s25 = sadd.s32 1, %s1964_s22 }
  0x1c   : > { %2440 = sst [smem:[#allocation26_spill]] %s1956_s20  ;;  %p43_p0 = scmp.ge.s32.totalorder %s42_s24, 2 }
  0x1d   : > { %2441 = sst [smem:[#allocation27_spill]] %s1960_s21  ;;  %s70_s26 = ssub.s32 1, %s1964_s22 }
  0x1e   : > { %2442 = sst [smem:[#allocation28_spill]] %s1964_s22  ;;  %s71_s27 = smul.u32 %s1960_s21, %s70_s26 }
  0x1f   : > { %2443 = sst [smem:[#allocation29_spill]] %s1968_s23  ;;  %s79_s28 = sadd.s32 1, %s1948_s18 }
  0x20   : > { %s2496_s24 = smov (%p43_p0, %s42_s24), 0  ;;  %s2498_s25 = smov (!%p43_p0, %s45_s25), %s1964_s22 }
  0x21   : > { %2444 = sst [smem:[#allocation30_spill]] %s2496_s24  ;;  %s2098_s29 = sadd.s32 %s1964_s22, %s71_s27 }
  0x22   : > { %p86_p1 = scmp.ne.s32.totalorder %s1948_s18, %s1944_s17  ;;  %p47_p2 = scmp.ge.s32.totalorder %s2498_s25, 2 }
  0x23   : > { %p87_p3 = scmp.eq.s32.totalorder %s1968_s23, 0  ;;  %p1505_p4 = scmp.lt.s32.totalorder %s1968_s23, 4 }
  0x24   : > { %s2500_s25 = smov (%p47_p2, %s2498_s25), 0  ;;  %s2418_s10 = sand.u32 1, %s1948_s18  }
  0x25   : > { %p2108_p5 = por %p87_p3, %p86_p1  ;;  %s73_s12 = ssub.s32 1, %s2500_s25 }
  0x26   : > { %s74_s27 = smul.u32 %s73_s12, %s2496_s24  ;;  %s1272_s9 = sshll.u32 %s2098_s29, 2 }
  0x27   : > { %s1271_s4 = sshll.u32 %s2418_s10, 6  ;;  %s2446_s1 = sld [smem:[#allocation33_spill]] }
  0x28   : > { %s75_s8 = sadd.s32 %s74_s27, %s2500_s25  ;;  %s370_s11 = scalar_lea.vmem [#allocation6], %s1271_s4 }
  0x29   : > { %s76_s6 = ssub.s32 %s2098_s29, %s75_s8  ;;  %s380_s21 = sshll.u32 %s370_s11, 4  ;;  %s381_s21 = int_to_ptr.vmem [resolvable:$true] %s380_s21 }
  0x2a   : > { %p77_p6 = scmp.eq.s32.totalorder %s76_s6, 0  ;;  %p2133_p7 = pnand %p1505_p4, %p2108_p5 }
  0x2b   : > { %s2449_s8 = sand.u32 1, %s1968_s23   ;;  %s2423_s19 = smov 4  }
  0x2c   : > { %s2127_s22 = scalar_select %p77_p6, %s1948_s18, %s79_s28  }
  0x2d   : > { %s377_s7 = scalar_lea.hbm %s2446_s1, %s1272_s9  ;;  %s2139_s6 = scalar_lea.sflag [#allocation7], %s2449_s8 }
  0x2e   : > { %s378_s5 = sshll.u32 %s377_s7, 4  ;;  %2447 = sst [smem:[#allocation31_spill]] %s2127_s22  ;;  %s379_s5 = int_to_ptr.hbm [resolvable:$true] %s378_s5 }
  0x2f   : > { %s2420_s9 = smov 128   ;;  %s2421_s7 = smov 64  }
  0x30   : > { %1491 = dma.hbm_to_vmem [thread:$0]  (!%p2133_p7), %s379_s5, 1024, %s381_s21, %s2139_s6, %s2420_s9, %s2421_s7, %s2423_s19  }
  0x31   : > { %s1428_s20 = sshll.u32 %s2098_s29, 6  ;;  %s2450_s3 = sld [smem:[#allocation35_spill]] }
  0x32   : > { %s416_s27 = scalar_lea.vmem [#allocation9], %s1271_s4  ;;  %s2451_s10 = sand.u32 1, %s1968_s23  }
  0x33   : > { %s427_s26 = sshll.u32 %s416_s27, 4  ;;  %s2153_s1 = scalar_lea.sflag [#allocation10], %s2451_s10  ;;  %s428_s26 = int_to_ptr.vmem [resolvable:$true] %s427_s26 }
  0x34   : > { %p1652_p9 = pneg %p2133_p7 }
  0x37   : > { %s424_s11 = scalar_lea.hbm %s2450_s3, %s1428_s20  ;;  %s1655_s4 = scalar_lea.hbm %s2450_s3, 128 }
  0x38   : > { %s425_s8 = sshll.u32 %s424_s11, 4  ;;  %s426_s8 = int_to_ptr.hbm [resolvable:$true] %s425_s8 }
  0x39   : > { %s1648_s22 = sshra.s32 %s426_s8, 4  ;;  %s1649_s22 = int_to_ptr.hbm [resolvable:$true] %s1648_s22 }
  0x3a   : > { %s1650_s24 = scalar_lea.hbm %s1649_s22, 64 }
  0x3b   : > { %p1651_p8 = scmp.ne.s32.totalorder %s1649_s22, %s1650_s24  ;;  %p1657_p12 = scmp.lt.s32.totalorder %s1655_s4, %s1650_s24 }
  0x3d   : > { %p1653_p10 = pnand %p1652_p9, %p1651_p8 }
  0x3f   : > { %p1654_p11 = pneg %p1653_p10 }
  0x41   : > { %p1659_p13 = pnand %p1657_p12, %p1654_p11 }
  0x43   : > { %1662 = shalt.err (!%p1659_p13)
}
  0x44   : > { %1497 = dma.hbm_to_vmem [thread:$0]  (!%p2133_p7), %s426_s8, 1024, %s428_s26, %s2153_s1, %s2421_s7, %s2421_s7, %s2423_s19  }
  0x45   : > { %s2170_s10 = sadd.s32 4294967295, %s1968_s23   ;;  %p92_p0 = scmp.ne.s32.totalorder %s1944_s17, %s1940_s16 }
  0x46   : > { %p93_p1 = scmp.eq.s32.totalorder %s2170_s10, 0  ;;  %p199_p2 = scmp.ne.s32.totalorder %s1936_s15, %s1932_s14 }
  0x47   : > { %p205_p6 = scmp.ne.s32.totalorder %s1932_s14, %s1928_s13  ;;  %p1268_p10 = scmp.ge.s32.totalorder %s1968_s23, 1 }
  0x48   : > { %p2180_p5 = por %p93_p1, %p92_p0  ;;  %p201_p8 = por %p199_p2, %p87_p3 }
  0x49   : > { %p2191_p11 = por %p205_p6, %p93_p1  ;;  %p335_p12 = scmp.lt.s32.totalorder %s1968_s23, 5 }
  0x4a   : > { %s2454_s0 = sld [smem:[#allocation32_spill]]  ;;  %p2205_p0 = pnand %p1505_p4, %p201_p8 }
  0x4b   : > { %p2199_p13 = pnand %p1268_p10, %p335_p12  ;;  %s1973_s11 = smov [#allocation3]  }
  0x4c   : > { %s349_s27 = sshll.u32 %s1973_s11, 4  ;;  %s2457_s8 = sand.u32 1, %s1948_s18   ;;  %s350_s27 = int_to_ptr.vmem [resolvable:$true] %s349_s27 }
  0x4d   : > { %p1484_p3 = pneg %p2199_p13  ;;  %s1273_s5 = sshll.u32 %s2457_s8, 1 }
  0x4e   : > { %s1274_s21 = sshll.u32 %s2098_s29, 1  ;;  %s2458_s2 = sld [smem:[#allocation34_spill]] }
  0x4f   : > { %p1485_p2 = pnand %p1484_p3, %p93_p1  ;;  %s394_s7 = scalar_lea.vmem [#allocation8], %s1273_s5 }
  0x50   : > { %s347_s28 = sshll.u32 %s2454_s0, 4  ;;  %s405_s19 = sshll.u32 %s394_s7, 4  ;;  %s348_s28 = int_to_ptr.hbm [resolvable:$true] %s347_s28  ;;  %s406_s19 = int_to_ptr.vmem [resolvable:$true] %s405_s19 }
  0x51   : > { %1487 = dma.hbm_to_vmem [thread:$0]  (!%p1485_p2), %s348_s28, 128, %s350_s27, [#allocation4]  }
  0x54   : > { %s401_s20 = scalar_lea.hbm %s2458_s2, %s1274_s21  ;;  %s1715_s0 = scalar_lea.hbm %s2458_s2, 4 }
  0x55   : > { %s403_s9 = sshll.u32 %s401_s20, 4  ;;  %s404_s9 = int_to_ptr.hbm [resolvable:$true] %s403_s9 }
  0x56   : > { %s1708_s22 = sshra.s32 %s404_s9, 4  ;;  %s1709_s22 = int_to_ptr.hbm [resolvable:$true] %s1708_s22 }
  0x57   : > { %s1710_s11 = scalar_lea.hbm %s1709_s22, 2 }
  0x58   : > { %p1711_p4 = scmp.ne.s32.totalorder %s1709_s22, %s1710_s11  ;;  %p1717_p10 = scmp.lt.s32.totalorder %s1715_s0, %s1710_s11 }
  0x5a   : > { %p1713_p6 = pnand %p1711_p4, %p1652_p9 }
  0x5c   : > { %p1714_p8 = pneg %p1713_p6 }
  0x5e   : > { %p1719_p12 = pnand %p1717_p10, %p1714_p8 }
  0x60   : > { %1722 = shalt.err (!%p1719_p12)
}
  0x61   : > { %s2459_s7 = sld [smem:[#allocation28_spill]]  ;;  %s439_s5 = sand.u32 1, %s1936_s15  }
  0x62   : > { %s2460_s28 = sld [smem:[#allocation27_spill]]  ;;  %s1278_s21 = sshll.u32 %s439_s5, 6 }
  0x63   : > { %s2461_s27 = sld [smem:[#allocation30_spill]]  ;;  %s441_s29 = scalar_lea.vmem [#allocation11], %s1278_s21 }
  0x64   : > { %1494 = dma.hbm_to_vmem [thread:$0]  (!%p2133_p7), %s404_s9, 32, %s406_s19, %s2139_s6  }
  0x65   : > { %s2463_s11 = sld [smem:[#allocation37_spill]]  ;;  %s449_s2 = sshll.u32 %s441_s29, 4  ;;  %s450_s2 = int_to_ptr.vmem [resolvable:$true] %s449_s2 }
  0x66   : > { %s2464_s3 = sadd.s32 1, %s1936_s15  ;;  %s2465_s6 = smov 4  }
  0x67   : > { %s2466_s9 = smov 64   ;;  %s2467_s19 = smov 128  }
  0x68   : > { %s187_s22 = smul.u32 %s2460_s28, %s2459_s7  ;;  %s472_s28 = scalar_lea.vmem [#allocation12], %s1278_s21 }
  0x69   : > { %s2462_s4 = smul.u32 %s2500_s25, %s2461_s27  ;;  %s481_s27 = sshll.u32 %s472_s28, 4  ;;  %s482_s27 = int_to_ptr.vmem [resolvable:$true] %s481_s27 }
  0x6a   : > { %s1279_s16 = sshll.u32 %s187_s22, 2  ;;  %s1429_s7 = sshll.u32 %s187_s22, 6 }
  0x6b   : > { %s189_s0 = ssub.s32 %s187_s22, %s2462_s4  ;;  %s446_s8 = scalar_lea.hbm %s2463_s11, %s1279_s16 }
  0x6c   : > { %p190_p9 = scmp.eq.s32.totalorder %s189_s0, 0  ;;  %s447_s23 = sshll.u32 %s446_s8, 4  ;;  %s448_s23 = int_to_ptr.hbm [resolvable:$true] %s447_s23 }
  0x6d   : > { %1500 = dma.hbm_to_vmem [thread:$0]  (!%p2205_p0), %s448_s23, 1024, %s450_s2, %s2153_s1, %s2467_s19, %s2466_s9, %s2465_s6  }
  0x6e   : > { %s2240_s18 = scalar_select %p190_p9, %s1936_s15, %s2464_s3  }
  0x6f   : > { %s2468_s16 = sld [smem:[#allocation39_spill]]  ;;  %s469_s3 = scalar_lea.sflag [#allocation13], %s439_s5 }
  0x73   : > { %493 = sbr.rel (%p2199_p13) target bundleno = 935 (0x3a7), region = 56 }
  0x75   : > { %s478_s20 = scalar_lea.hbm %s2468_s16, %s1429_s7 }
  0x76   : > { %s479_s12 = sshll.u32 %s478_s20, 4  ;;  %s480_s12 = int_to_ptr.hbm [resolvable:$true] %s479_s12 }
  0x77   : > { %1503 = dma.hbm_to_vmem [thread:$0]  (!%p2205_p0), %s480_s12, 1024, %s482_s27, %s469_s3, %s2466_s9, %s2466_s9, %s2465_s6  }
  0x78   : > { %1899 = dma.done.wait (%p93_p1), [#allocation4], 128  }
  0x79   : > { %1901 = vsyncadd (%p93_p1), [#allocation4], 4294967168  ;;  %s500_s1 = sand.u32 1, %s2170_s10   ;;  %s502_s2 = sand.u32 1, %s1944_s17  }
  0x7a   : > { %s1285_s23 = sshll.u32 %s502_s2, 6  ;;  %s501_s13 = scalar_lea.sflag [#allocation7], %s500_s1 }
  0x7b   : > { %s2264_s22 = scalar_lea.vmem [#allocation6], %s1285_s23 }
  0x7c   : > { %1903 = dma.done.wait (%p2180_p5), %s501_s13, 1056  }
  0x7d   : > { %1905 = vsyncadd (%p2180_p5), %s501_s13, 4294966240  ;;  %s2270_s30 = sshll.u32 %s502_s2, 1  ;;  %s521_s21 = scalar_lea.sflag [#allocation10], %s500_s1 }
  0x7e   : > { %s514_s5 = scalar_lea.vmem [#allocation8], %s2270_s30  ;;  %s2273_s11 = scalar_lea.vmem [#allocation9], %s1285_s23 }
  0x7f   : > { %1907 = dma.done.wait (%p2180_p5), %s521_s21, 1024  }
  0x80   : > { %1909 = vsyncadd (%p2180_p5), %s521_s21, 4294966272  ;;  %s532_s8 = sand.u32 1, %s1932_s14  }
  0x81   : > { %s1288_s29 = sshll.u32 %s532_s8, 6 }
  0x82   : > { %s2280_s6 = scalar_lea.vmem [#allocation11], %s1288_s29 }
  0x83   : > { %1911 = dma.done.wait (%p2191_p11), %s521_s21, 1024  }
  0x84   : > { %1913 = vsyncadd (%p2191_p11), %s521_s21, 4294966272  ;;  %s541_s9 = scalar_lea.sflag [#allocation13], %s532_s8  ;;  %s2286_s19 = scalar_lea.vmem [#allocation12], %s1288_s29 }
  0x85   : > { %1915 = dma.done.wait (%p2191_p11), %s541_s9, 1024  }
  0x86   : > { %1917 = vsyncadd (%p2191_p11), %s541_s9, 4294966272  ;;  %s2469_s24 = sld [smem:[#allocation26_spill]] }
  0x87   : > { %s2470_s7 = sld [smem:[#allocation25_spill]] }
  0x88   : > { %s2471_s16 = sld [smem:[#allocation38_spill]] }
  0x8d   : > { %s613_s28 = smul.u32 %s2470_s7, %s2469_s24  ;;  %p1291_p1 = scmp.ne.s32.totalorder %s2470_s7, 0 }
  0x8f   : > { %p614_p7 = scmp.lt.s32.totalorder %s613_s28, 1  ;;  %624 = sbr.rel (%p1291_p1) target bundleno = 150 (0x96), region = 84 }
  0x91   : > { %s2502_s28 = smov (!%p614_p7, %s613_s28), 1 }
  0x92   : > { %s1290_s27 = sshll.u32 %s2502_s28, 1 }
  0x93   : > { %s2297_s20 = scalar_lea.vmem %s2471_s16, %s1290_s27 }
  0x94   : > { %v1974_v0 = vmov 0.0  }
  0x95   : > { %625 = vst [vmem:[#allocation2] sm:$0xff] %v1974_v0 }
  0x96 PF: > { %s2472_s12 = sld [smem:[#allocation26_spill]] }
  0x9c   : > { %p626_p5 = scmp.eq.s32.totalorder %s2472_s12, 0  ;;  %p1292_p11 = scmp.ne.s32.totalorder %s2472_s12, 0 }
  0x9e   : > { %629 = sbr.rel (%p1292_p11) target bundleno = 519 (0x207), region = 88 }
  0xa3   : > { %v1437_v1 = vld [vmem:[%s2264_s22 + $0x38] sm:$0xff]  ;;  %v1436_v2 = vld [vmem:[%s2264_s22 + $0x30] sm:$0xff]  ;;  %v1435_v3 = vld [vmem:[%s2264_s22 + $0x28] sm:$0xff]  ;;  %v1975_v11 = vmov 8.0  }
  0xa4   : > { %696 = vmatpush.bf16.msra.mxu0 %v1437_v1  ;;  %v1434_v4 = vld [vmem:[%s2264_s22 + $0x20] sm:$0xff]  ;;  %v1433_v5 = vld [vmem:[%s2264_s22 + $0x18] sm:$0xff]  ;;  %v1432_v6 = vld [vmem:[%s2264_s22 + $0x10] sm:$0xff]  ;;  %1608 = vrcp.f32 %v1975_v11 }
  0xa5   : > { %v1431_v7 = vld [vmem:[%s2264_s22 + $0x8] sm:$0xff]  ;;  %v1430_v8 = vld [vmem:[%s2264_s22] sm:$0xff]  ;;  %v630_v9 = vld [vmem:[#allocation3] sm:$0xff] }
  0xa6   : > { %v631_v10 = vpack.c.bf16 %v630_v9, %v630_v9  ;;  %v1445_v16 = vld [vmem:[%s2273_s11 + $0x38] sm:$0xff]  ;;  %v1444_v20 = vld [vmem:[%s2273_s11 + $0x30] sm:$0xff]  ;;  %v1443_v25 = vld [vmem:[%s2273_s11 + $0x28] sm:$0xff] }
  0xa7   : > { %816 = vmatpush.bf16.msra.mxu1 %v1445_v16  ;;  %v1442_v29 = vld [vmem:[%s2273_s11 + $0x20] sm:$0xff]  ;;  %v1441_v31 = vld [vmem:[%s2273_s11 + $0x18] sm:$0xff]  ;;  %v1440_v34 = vld [vmem:[%s2273_s11 + $0x10] sm:$0xff] }
  0xa8   : > { %697 = vmatpush.bf16.msra.mxu0 %v1436_v2  ;;  %v1439_v37 = vld [vmem:[%s2273_s11 + $0x8] sm:$0xff]  ;;  %v1438_v40 = vld [vmem:[%s2273_s11] sm:$0xff]  ;;  %v709_v50 = vld [vmem:[%s514_s5] sm:$0x3] }
  0xa9   : > { %v747_v55 = vperm.slane %v709_v50, 1  ;;  %v750_v60 = vld [vmem:[#allocation2] sm:$0xff] }
  0xaa   : > { %v1609_v12 = vpop.eup %1608 }
  0xab   : > { %v717_v13 = vmul.f32 8.0, %v1609_v12  ;;  %817 = vmatpush.bf16.msra.mxu1 %v1444_v20  ;;  %vm721_vm0 = vweird.f32 %v1609_v12 }
  0xac   : > { %698 = vmatpush.bf16.msra.mxu0 %v1435_v3 }
  0xad   : > { %v718_v14 = vsub.f32 1.0, %v717_v13 }
  0xaf   : > { %v719_v18 = vmul.f32 %v1609_v12, %v718_v14  ;;  %818 = vmatpush.bf16.msra.mxu1 %v1443_v25 }
  0xb0   : > { %699 = vmatpush.bf16.msra.mxu0 %v1434_v4 }
  0xb1   : > { %v720_v22 = vadd.f32 %v1609_v12, %v719_v18 }
  0xb3   : > { %v722_v27 = vsel %vm721_vm0, %v1609_v12, %v720_v22  ;;  %819 = vmatpush.bf16.msra.mxu1 %v1442_v29 }
  0xb4   : > { %700 = vmatpush.bf16.msra.mxu0 %v1433_v5 }
  0xb7   : > { %820 = vmatpush.bf16.msra.mxu1 %v1441_v31 }
  0xb8   : > { %701 = vmatpush.bf16.msra.mxu0 %v1432_v6 }
  0xbb   : > { %821 = vmatpush.bf16.msra.mxu1 %v1440_v34 }
  0xbc   : > { %702 = vmatpush.bf16.msra.mxu0 %v1431_v7 }
  0xbf   : > { %822 = vmatpush.bf16.msra.mxu1 %v1439_v37 }
  0xc0   : > { %703 = vmatpush.bf16.msra.mxu0 %v1430_v8 }
  0xc3   : > { %704 = vmatmul.bf16.vlgmr.msra.gmra.mxu0 %v631_v10  ;;  %823 = vmatpush.bf16.msra.mxu1 %v1438_v40 }
 0x140   : > { %v705_v15 = vpop.f32.mrf.mxu0 }
 0x141   : > { %v710_v17 = vrot.slane %v705_v15, 4 }
 0x143   : > { %v711_v19 = vadd.f32 %v710_v17, %v705_v15 }
 0x145   : > { %v712_v21 = vrot.slane %v711_v19, 2 }
 0x147   : > { %v713_v23 = vadd.f32 %v712_v21, %v711_v19 }
 0x148   : > { %v707_v24 = vpop.f32.mrf.mxu0 }
 0x149   : > { %v714_v26 = vrot.slane %v713_v23, 1 }
 0x14b   : > { %v715_v28 = vadd.f32 %v714_v26, %v713_v23 }
 0x14d   : > { %v723_v30 = vmul.f32 %v722_v27, %v715_v28 }
 0x14f   : > { %v724_v32 = vsub.f32 %v705_v15, %v723_v30 }
 0x151   : > { %v725_v33 = vmul.f32 %v724_v32, %v724_v32 }
 0x153   : > { %v726_v35 = vrot.slane %v725_v33, 4 }
 0x155   : > { %v727_v36 = vadd.f32 %v726_v35, %v725_v33 }
 0x157   : > { %v728_v38 = vrot.slane %v727_v36, 2 }
 0x159   : > { %v729_v39 = vadd.f32 %v728_v38, %v727_v36 }
 0x15b   : > { %v730_v41 = vrot.slane %v729_v39, 1 }
 0x15d   : > { %v731_v42 = vadd.f32 %v730_v41, %v729_v39 }
 0x15f   : > { %v732_v43 = vmul.f32 %v731_v42, %v722_v27 }
 0x161   : > { %v733_v44 = vadd.f32 1e-05, %v732_v43 }
 0x163   : > { %1610 = vrsqrt.f32 %v733_v44  ;;  %vm740_vm2 = vweird.f32 %v733_v44 }
 0x169   : > { %v1611_v45 = vpop.eup %1610 }
 0x16a   : > { %v735_v46 = vmul.f32 %v1611_v45, %v733_v44  ;;  %vm741_vm1 = vweird.f32 %v1611_v45 }
 0x16b   : > { %vm742_vm3 = vmor %vm740_vm2, %vm741_vm1 }
 0x16c   : > { %v736_v47 = vmul.f32 %v1611_v45, %v735_v46 }
 0x16e   : > { %v737_v48 = vmul.f32 0.5, %v736_v47 }
 0x170   : > { %v738_v49 = vsub.f32 1.5, %v737_v48 }
 0x172   : > { %v739_v51 = vmul.f32 %v1611_v45, %v738_v49 }
 0x174   : > { %v743_v52 = vsel %vm742_vm3, %v1611_v45, %v739_v51 }
 0x175   : > { %v744_v53 = vmul.f32 %v743_v52, %v709_v50 }
 0x177   : > { %v745_v54 = vperm.slane %v744_v53, 0 }
 0x179   : > { %v746_v56 = vmul.f32 %v745_v54, %v724_v32 }
 0x17b   : > { %v748_v57 = vadd.f32 %v747_v55, %v746_v56 }
 0x17d   : > { %v749_v58 = vmax.f32 %v748_v57, 0.0 }
 0x17f   : > { %v751_v59 = vpack.c.bf16 %v749_v58, %v749_v58 }
 0x181   : > { %824 = vmatmul.bf16.vlgmr.msra.gmra.mxu1 %v751_v59 }
 0x1fe   : > { %v825_v61 = vpop.f32.mrf.mxu1 }
 0x1ff   : > { %v829_v62 = vadd.f32 %v825_v61, %v750_v60 }
 0x201   : > { %830 = vst [vmem:[#allocation2] sm:$0xff] %v829_v62 }
 0x206   : > { %v827_v63 = vpop.f32.mrf.mxu1 }
 0x207 PF: > { %s2473_s26 = sld [smem:[#allocation26_spill]] }
 0x20d   : > { %p831_p13 = scmp.eq.s32.totalorder %s2473_s26, 1  ;;  %p1357_p0 = scmp.ne.s32.totalorder %s2473_s26, 1 }
 0x20f   : > { %834 = sbr.rel (%p1357_p0) target bundleno = 888 (0x378), region = 92 }
 0x214   : > { %v1453_v0 = vld [vmem:[%s2280_s6 + $0x38] sm:$0xff]  ;;  %v1452_v1 = vld [vmem:[%s2280_s6 + $0x30] sm:$0xff]  ;;  %v1451_v2 = vld [vmem:[%s2280_s6 + $0x28] sm:$0xff]  ;;  %v1976_v10 = vmov 8.0  }
 0x215   : > { %901 = vmatpush.bf16.msra.mxu0 %v1453_v0  ;;  %v1450_v3 = vld [vmem:[%s2280_s6 + $0x20] sm:$0xff]  ;;  %v1449_v4 = vld [vmem:[%s2280_s6 + $0x18] sm:$0xff]  ;;  %v1448_v5 = vld [vmem:[%s2280_s6 + $0x10] sm:$0xff]  ;;  %1612 = vrcp.f32 %v1976_v10 }
 0x216   : > { %v1447_v6 = vld [vmem:[%s2280_s6 + $0x8] sm:$0xff]  ;;  %v1446_v7 = vld [vmem:[%s2280_s6] sm:$0xff]  ;;  %v1461_v15 = vld [vmem:[%s2286_s19 + $0x38] sm:$0xff] }
 0x217   : > { %v835_v8 = vld [vmem:[#allocation14] sm:$0xff]  ;;  %1021 = vmatpush.bf16.msra.mxu1 %v1461_v15  ;;  %v1460_v19 = vld [vmem:[%s2286_s19 + $0x30] sm:$0xff]  ;;  %v1459_v24 = vld [vmem:[%s2286_s19 + $0x28] sm:$0xff] }
 0x218   : > { %v836_v9 = vpack.c.bf16 %v835_v8, %v835_v8  ;;  %v1458_v28 = vld [vmem:[%s2286_s19 + $0x20] sm:$0xff]  ;;  %v1457_v30 = vld [vmem:[%s2286_s19 + $0x18] sm:$0xff]  ;;  %v1456_v33 = vld [vmem:[%s2286_s19 + $0x10] sm:$0xff] }
 0x219   : > { %902 = vmatpush.bf16.msra.mxu0 %v1452_v1  ;;  %v1455_v36 = vld [vmem:[%s2286_s19 + $0x8] sm:$0xff]  ;;  %v1454_v39 = vld [vmem:[%s2286_s19] sm:$0xff] }
 0x21a   : > { %v914_v49 = vld [vmem:[%s2297_s20] sm:$0x3] }
 0x21b   : > { %v1613_v11 = vpop.eup %1612  ;;  %1022 = vmatpush.bf16.msra.mxu1 %v1460_v19  ;;  %v952_v54 = vperm.slane %v914_v49, 1  ;;  %v955_v59 = vld [vmem:[#allocation2] sm:$0xff] }
 0x21c   : > { %v922_v12 = vmul.f32 8.0, %v1613_v11  ;;  %vm926_vm4 = vweird.f32 %v1613_v11 }
 0x21d   : > { %903 = vmatpush.bf16.msra.mxu0 %v1451_v2 }
 0x21e   : > { %v923_v13 = vsub.f32 1.0, %v922_v12 }
 0x21f   : > { %1023 = vmatpush.bf16.msra.mxu1 %v1459_v24 }
 0x220   : > { %v924_v17 = vmul.f32 %v1613_v11, %v923_v13 }
 0x221   : > { %904 = vmatpush.bf16.msra.mxu0 %v1450_v3 }
 0x222   : > { %v925_v21 = vadd.f32 %v1613_v11, %v924_v17 }
 0x223   : > { %1024 = vmatpush.bf16.msra.mxu1 %v1458_v28 }
 0x224   : > { %v927_v26 = vsel %vm926_vm4, %v1613_v11, %v925_v21 }
 0x225   : > { %905 = vmatpush.bf16.msra.mxu0 %v1449_v4 }
 0x227   : > { %1025 = vmatpush.bf16.msra.mxu1 %v1457_v30 }
 0x229   : > { %906 = vmatpush.bf16.msra.mxu0 %v1448_v5 }
 0x22b   : > { %1026 = vmatpush.bf16.msra.mxu1 %v1456_v33 }
 0x22d   : > { %907 = vmatpush.bf16.msra.mxu0 %v1447_v6 }
 0x22f   : > { %1027 = vmatpush.bf16.msra.mxu1 %v1455_v36 }
 0x231   : > { %908 = vmatpush.bf16.msra.mxu0 %v1446_v7 }
 0x233   : > { %1028 = vmatpush.bf16.msra.mxu1 %v1454_v39 }
 0x234   : > { %909 = vmatmul.bf16.vlgmr.msra.gmra.mxu0 %v836_v9 }
 0x2b1   : > { %v910_v14 = vpop.f32.mrf.mxu0 }
 0x2b2   : > { %v915_v16 = vrot.slane %v910_v14, 4 }
 0x2b4   : > { %v916_v18 = vadd.f32 %v915_v16, %v910_v14 }
 0x2b6   : > { %v917_v20 = vrot.slane %v916_v18, 2 }
 0x2b8   : > { %v918_v22 = vadd.f32 %v917_v20, %v916_v18 }
 0x2b9   : > { %v912_v23 = vpop.f32.mrf.mxu0 }
 0x2ba   : > { %v919_v25 = vrot.slane %v918_v22, 1 }
 0x2bc   : > { %v920_v27 = vadd.f32 %v919_v25, %v918_v22 }
 0x2be   : > { %v928_v29 = vmul.f32 %v927_v26, %v920_v27 }
 0x2c0   : > { %v929_v31 = vsub.f32 %v910_v14, %v928_v29 }
 0x2c2   : > { %v930_v32 = vmul.f32 %v929_v31, %v929_v31 }
 0x2c4   : > { %v931_v34 = vrot.slane %v930_v32, 4 }
 0x2c6   : > { %v932_v35 = vadd.f32 %v931_v34, %v930_v32 }
 0x2c8   : > { %v933_v37 = vrot.slane %v932_v35, 2 }
 0x2ca   : > { %v934_v38 = vadd.f32 %v933_v37, %v932_v35 }
 0x2cc   : > { %v935_v40 = vrot.slane %v934_v38, 1 }
 0x2ce   : > { %v936_v41 = vadd.f32 %v935_v40, %v934_v38 }
 0x2d0   : > { %v937_v42 = vmul.f32 %v936_v41, %v927_v26 }
 0x2d2   : > { %v938_v43 = vadd.f32 1e-05, %v937_v42 }
 0x2d4   : > { %1614 = vrsqrt.f32 %v938_v43  ;;  %vm945_vm6 = vweird.f32 %v938_v43 }
 0x2da   : > { %v1615_v44 = vpop.eup %1614 }
 0x2db   : > { %v940_v45 = vmul.f32 %v1615_v44, %v938_v43  ;;  %vm946_vm5 = vweird.f32 %v1615_v44 }
 0x2dc   : > { %vm947_vm7 = vmor %vm945_vm6, %vm946_vm5 }
 0x2dd   : > { %v941_v46 = vmul.f32 %v1615_v44, %v940_v45 }
 0x2df   : > { %v942_v47 = vmul.f32 0.5, %v941_v46 }
 0x2e1   : > { %v943_v48 = vsub.f32 1.5, %v942_v47 }
 0x2e3   : > { %v944_v50 = vmul.f32 %v1615_v44, %v943_v48 }
 0x2e5   : > { %v948_v51 = vsel %vm947_vm7, %v1615_v44, %v944_v50 }
 0x2e6   : > { %v949_v52 = vmul.f32 %v948_v51, %v914_v49 }
 0x2e8   : > { %v950_v53 = vperm.slane %v949_v52, 0 }
 0x2ea   : > { %v951_v55 = vmul.f32 %v950_v53, %v929_v31 }
 0x2ec   : > { %v953_v56 = vadd.f32 %v952_v54, %v951_v55 }
 0x2ee   : > { %v954_v57 = vmax.f32 %v953_v56, 0.0 }
 0x2f0   : > { %v956_v58 = vpack.c.bf16 %v954_v57, %v954_v57 }
 0x2f2   : > { %1029 = vmatmul.bf16.vlgmr.msra.gmra.mxu1 %v956_v58 }
 0x36f   : > { %v1030_v60 = vpop.f32.mrf.mxu1 }
 0x370   : > { %v1034_v61 = vadd.f32 %v1030_v60, %v955_v59 }
 0x372   : > { %1035 = vst [vmem:[#allocation2] sm:$0xff] %v1034_v61 }
 0x377   : > { %v1032_v62 = vpop.f32.mrf.mxu1 }
 0x378 PF: > { %s2474_s3 = sld [smem:[#allocation25_spill]] }
 0x37e   : > { %p1036_p3 = scmp.eq.s32.totalorder %s2474_s3, 1 }
 0x380   : > { %p1037_p2 = pnand %p1036_p3, %p626_p5 }
 0x381   : > { %s2476_s13 = sld [smem:[#allocation36_spill]] (!%p1037_p2) }
 0x382   : > { %1040 = sbr.rel (%p1037_p2) target bundleno = 908 (0x38c), region = 96 }
 0x387   : > { %v1041_v63 = vld [vmem:[#allocation2] sm:$0xff] }
 0x388   : > { %v1616_v0 = vld [vmem:[%s2476_s13] ss:$0 sm:$0xff] }
 0x389   : > { %v1046_v1 = vadd.f32 %v1616_v0, %v1041_v63 }
 0x38b   : > { %1047 = vst [vmem:[#allocation14] sm:$0xff] %v1046_v1 }
 0x38c PF: > { %p1048_p4 = pnand %p1036_p3, %p831_p13 }
 0x38d   : > { %s2478_s21 = sld [smem:[#allocation40_spill]] (!%p1048_p4) }
 0x38e   : > { %1051 = sbr.rel (%p1048_p4) target bundleno = 920 (0x398), region = 100 }
 0x393   : > { %v1052_v2 = vld [vmem:[#allocation2] sm:$0xff] }
 0x394   : > { %v1617_v3 = vld [vmem:[%s2478_s21] ss:$0 sm:$0xff] }
 0x395   : > { %v1057_v4 = vadd.f32 %v1617_v3, %v1052_v2 }
 0x397   : > { %1058 = vst [vmem:[#allocation15] sm:$0xff] %v1057_v4 }
 0x398 PF: > { %p1507_p6 = scmp.eq.s32.totalorder %s2170_s10, 3  ;;  %s2479_s29 = sld [smem:[#allocation41_spill]] }
 0x399   : > { %s1977_s9 = smov [#allocation14]   ;;  %s1978_s24 = smov [#allocation15]  }
 0x39a   : > { %s1065_s19 = sshll.u32 %s1977_s9, 4  ;;  %s1077_s7 = sshll.u32 %s1978_s24, 4  ;;  %s1066_s19 = int_to_ptr.vmem [resolvable:$true] %s1065_s19  ;;  %s1078_s7 = int_to_ptr.vmem [resolvable:$true] %s1077_s7 }
 0x39b   : > { %s2480_s4 = sld [smem:[#allocation42_spill]] }
 0x39e   : > { %s1067_s6 = sshll.u32 %s2479_s29, 4  ;;  %s1068_s6 = int_to_ptr.hbm [resolvable:$true] %s1067_s6 }
 0x39f   : > { %1477 = dma.vmem_to_hbm [thread:$0]  (%p1507_p6), %s1066_s19, 128, %s1068_s6, [#allocation5]  }
 0x3a1   : > { %s1079_s0 = sshll.u32 %s2480_s4, 4  ;;  %s1080_s0 = int_to_ptr.hbm [resolvable:$true] %s1079_s0 }
 0x3a2   : > { %1479 = dma.vmem_to_hbm [thread:$0]  (%p1507_p6), %s1078_s7, 128, %s1080_s0, [#allocation16]  }
 0x3a3   : > { %1919 = dma.done.wait (%p1507_p6), [#allocation5], 128  }
 0x3a4   : > { %1921 = vsyncadd (%p1507_p6), [#allocation5], 4294967168 }
 0x3a5   : > { %1923 = dma.done.wait (%p1507_p6), [#allocation16], 128  }
 0x3a6   : > { %1925 = vsyncadd (%p1507_p6), [#allocation16], 4294967168 }
 0x3a7 PF: > { %s2481_s16 = sld [smem:[#allocation29_spill]]  ;;  %s2487_s13 = smov %s1932_s14 }
 0x3a8   : > { %s2482_s20 = sld [smem:[#allocation24_spill]]  ;;  %s2488_s14 = smov %s1936_s15 }
 0x3a9   : > { %s2483_s12 = sld [smem:[#allocation31_spill]]  ;;  %s2489_s15 = smov %s2240_s18 }
 0x3aa   : > { %s2484_s19 = sld [smem:[#allocation27_spill]]  ;;  %s2494_s22 = smov %s2500_s25 }
 0x3ab   : > { %s2485_s26 = sld [smem:[#allocation28_spill]] }
 0x3ac   : > { %s2486_s21 = sld [smem:[#allocation30_spill]] }
 0x3ad   : > { %s33_s23 = sadd.s32 1, %s2481_s16   ;;  %s2490_s16 = smov %s1944_s17 }
 0x3ae   : > { %p30_p8 = scmp.ge.s32.totalorder %s33_s23, 6   ;;  %s2491_s17 = smov %s2482_s20 }
 0x3af   : > { %s2492_s18 = smov %s2483_s12 }
 0x3b0   :  { %32 = sbr.rel (!%p30_p8) target bundleno = 26 (0x1a), region = 177 }
 0x3b1   : > { %s2493_s20 = smov %s2485_s26 }
 0x3b5   :  { %1098 = vsyncpa [#allocation4], 1 }
 0x3b6   :  { %1100 = vsyncpa [#allocation4 + $0x1], 1 }
 0x3b7   :  { %1101 = vsyncpa [#allocation7], 1 }
 0x3b8   :  { %1103 = vsyncpa [#allocation7 + $0x1], 1 }
 0x3b9   :  { %1104 = vsyncpa [#allocation10], 1 }
 0x3ba   :  { %1106 = vsyncpa [#allocation10 + $0x1], 1 }
 0x3bb   :  { %1107 = vsyncpa [#allocation13], 1 }
 0x3bc   :  { %1109 = vsyncpa [#allocation13 + $0x1], 1 }
 0x3bd   :  { %1110 = vsyncpa [#allocation5], 1 }
 0x3be   :  { %1112 = vsyncpa [#allocation5 + $0x1], 1 }
 0x3bf   :  { %1113 = vsyncpa [#allocation16], 1 }

</bundles_post_ra>
